<compile_context>
chip_gen: v6e
topology: v6e:2x2x1
jax: 0.10.0
libtpu: 0.0.40
codegen_flags: <defaults>
</compile_context>

<pallas_src>
import jax
import jax.numpy as jnp
from jax.experimental import pallas as pl
from jax.experimental.pallas import tpu as pltpu

# --- module hyperparameters (from the PyTorch source) ---
N_EMBD = 32
SEQ_SIZE = 8
NUM_HEADS = 4
HEAD_SIZE = N_EMBD // NUM_HEADS   # 8
DROPOUT = 0.0                     # dropout == 0 -> identity (no op emitted)


def mha_kernel(x_ref, wqkv_ref, wp_ref, bp_ref, o_ref):
    """One batch-block per grid step; all matmuls / softmax done in-kernel.

    x_ref : (b_blk*T, C)   rows ordered (b, t) = b*T + t
    wqkv  : (C, 3C)        [Wq*scale | Wk | Wv]  (scale folded into Q columns)
    wp    : (C, C)         output projection
    bp    : (1, C)         output projection bias
    o_ref : (b_blk*T, C)
    """
    BT, C = x_ref.shape
    T = SEQ_SIZE
    Bb = BT // T
    H, hs = NUM_HEADS, HEAD_SIZE

    # Fused QKV projection: one (Bb*T, C) @ (C, 3C) MXU matmul.
    qkv = jnp.dot(x_ref[...], wqkv_ref[...], preferred_element_type=jnp.float32)

    q = qkv[:, 0 * C:1 * C].reshape(Bb, T, C)
    k = qkv[:, 1 * C:2 * C].reshape(Bb, T, C)
    v = qkv[:, 2 * C:3 * C].reshape(Bb, T, C)

    # Merge (head, batch) into a single leading batch dim g = h*Bb + b so the
    # attention reduces to 2 batched dot_generals instead of 2*H per-head ones.
    qh = jnp.concatenate([q[:, :, h * hs:(h + 1) * hs] for h in range(H)], axis=0)
    kh = jnp.concatenate([k[:, :, h * hs:(h + 1) * hs] for h in range(H)], axis=0)
    vh = jnp.concatenate([v[:, :, h * hs:(h + 1) * hs] for h in range(H)], axis=0)
    # qh / kh / vh: (H*Bb, T, hs)

    # Causal mask, hoisted once (shared across all heads / batch rows).
    row = jax.lax.broadcasted_iota(jnp.int32, (T, T), 0)
    col = jax.lax.broadcasted_iota(jnp.int32, (T, T), 1)
    causal = (col <= row)[None]                       # (1, T, T)

    # Scores; the C**-0.5 scale is already folded into the Q weight columns.
    s = jnp.einsum("gtd,gsd->gts", qh, kh, preferred_element_type=jnp.float32)
    s = jnp.where(causal, s, jnp.float32(-1e30))      # finite fill: NaN-robust

    # Numerically-stable softmax along the key axis.
    s = s - jnp.max(s, axis=-1, keepdims=True)
    p = jnp.exp(s)
    p = p / jnp.sum(p, axis=-1, keepdims=True)
    # dropout(p) with p_drop == 0 -> identity

    ctx = jnp.einsum("gts,gsd->gtd", p, vh, preferred_element_type=jnp.float32)
    # ctx: (H*Bb, T, hs)

    # Output projection without the VMEM concat scratch: head h's context
    # multiplies rows [h*hs : (h+1)*hs] of Wp; accumulate in vregs.
    acc = jnp.zeros((BT, C), jnp.float32)
    for h in range(H):                                # unrolled at trace time
        ctx_h = ctx[h * Bb:(h + 1) * Bb].reshape(BT, hs)
        acc = acc + jnp.dot(ctx_h, wp_ref[h * hs:(h + 1) * hs, :],
                            preferred_element_type=jnp.float32)
    out = acc + bp_ref[...]
    o_ref[...] = out.astype(o_ref.dtype)


def fuse_mha_params(wq, wk, wv):
    """One-time parameter prep (hoisted out of the per-call wrapper):
    fuse Q/K/V weights into (C, 3C) and fold the C**-0.5 attention scale into
    the Q columns (constant fold on weights, not an input pre-scale)."""
    C = wq.shape[0]
    scale = jnp.asarray(C, jnp.float32) ** -0.5   # NOTE: n_embd, as in the PyTorch code
    return jnp.concatenate([wq * scale, wk, wv], axis=1)


def _pick_batch_block(B: int, max_blk: int = 512) -> int:
    """Largest divisor of B that is <= max_blk (keeps the grid exact).
    Big blocks amortize the ~0.35us/step overhead; VMEM cost is trivial
    (b_blk=512 -> ~0.5 MiB of x per buffer, far under 64 MiB on v7x)."""
    for cand in range(min(B, max_blk), 0, -1):
        if B % cand == 0:
            return cand
    return 1


def multi_head_attention(x, wqkv, wp, bp):
    """x: (B, T, C).  wqkv: (C, 3C) pre-fused/pre-scaled (see fuse_mha_params).
    wp: (C, C) in 'x @ W' orientation.  bp: (1, C)."""
    B, T, C = x.shape
    b_blk = _pick_batch_block(B)
    grid = (B // b_blk,)

    # 2-D I/O slabs: rows (B*T) fill the sublane axis, lanes = C.
    x2d = x.reshape(B * T, C)

    out2d = pl.pallas_call(
        mha_kernel,
        out_shape=jax.ShapeDtypeStruct((B * T, C), x.dtype),
        grid_spec=pltpu.PrefetchScalarGridSpec(
            num_scalar_prefetch=0,
            grid=grid,
            in_specs=[
                pl.BlockSpec((b_blk * T, C), lambda i: (i, 0)),   # x rows block
                pl.BlockSpec((C, 3 * C), lambda i: (0, 0)),        # fused Wqkv (resident)
                pl.BlockSpec((C, C), lambda i: (0, 0)),            # Wproj (resident)
                pl.BlockSpec((1, C), lambda i: (0, 0)),            # bproj (resident)
            ],
            out_specs=pl.BlockSpec((b_blk * T, C), lambda i: (i, 0)),
        ),
        # Batch-block axis; with B > max_blk the grid length is >= 2 and the
        # axis can be split across TensorCores (relevant on v7x).
        compiler_params=pltpu.CompilerParams(
            dimension_semantics=("parallel",)),
    )(x2d, wqkv, wp, bp)

    return out2d.reshape(B, T, C)


def reference_mha(x, wq, wk, wv, wp, bp):
    """Pure-JAX reference matching the PyTorch forward pass semantics."""
    B, T, C = x.shape
    q = x @ wq
    k = x @ wk
    v = x @ wv
    scale = C ** (-0.5)
    mask = jnp.tril(jnp.ones((T, T), dtype=bool))
    outs = []
    for h in range(NUM_HEADS):
        lo, hi = h * HEAD_SIZE, (h + 1) * HEAD_SIZE
        s = jnp.einsum("btd,bsd->bts", q[..., lo:hi], k[..., lo:hi]) * scale
        s = jnp.where(mask[None], s, -jnp.inf)
        p = jax.nn.softmax(s, axis=-1)
        outs.append(jnp.einsum("bts,bsd->btd", p, v[..., lo:hi]))
    cat = jnp.concatenate(outs, axis=-1)
    return cat @ wp + bp[0]


if __name__ == "__main__":
    B, T, C = 2, SEQ_SIZE, N_EMBD

    key = jax.random.PRNGKey(0)
    kx, kq, kk, kv, kp, kb = jax.random.split(key, 6)

    # Deterministic synthetic parameters (stand-ins for nn.Linear weights),
    # stored in "x @ W" orientation: W has shape (in_features, out_features);
    # column block h*head_size:(h+1)*head_size belongs to head h.
    x  = jax.random.normal(kx, (B, T, C), dtype=jnp.float32)
    wq = jax.random.normal(kq, (C, C), dtype=jnp.float32) * 0.1
    wk = jax.random.normal(kk, (C, C), dtype=jnp.float32) * 0.1
    wv = jax.random.normal(kv, (C, C), dtype=jnp.float32) * 0.1
    wp = jax.random.normal(kp, (C, C), dtype=jnp.float32) * 0.1
    bp = jax.random.normal(kb, (1, C), dtype=jnp.float32) * 0.1

    # One-time parameter prep (hoisted out of the call, per perf feedback).
    wqkv = fuse_mha_params(wq, wk, wv)

    out = multi_head_attention(x, wqkv, wp, bp)
    out = jax.block_until_ready(out)

    ref = reference_mha(x, wq, wk, wv, wp, bp)
    assert out.shape == (B, T, C)
    assert jnp.allclose(out, ref, atol=1e-4, rtol=1e-4), "mismatch vs JAX reference"

    print("KERNEL_OK")
</pallas_src>

<mosaic_0001>
module attributes {stable_mosaic.version = 11 : i64} {
  func.func @mha_kernel(%arg0: i32, %arg1: memref<16x32xf32, #tpu.memory_space<vmem>>, %arg2: memref<32x96xf32, #tpu.memory_space<vmem>>, %arg3: memref<32x32xf32, #tpu.memory_space<vmem>>, %arg4: memref<1x32xf32, #tpu.memory_space<vmem>>, %arg5: memref<16x32xf32, #tpu.memory_space<vmem>>) attributes {dimension_semantics = [#tpu.dimension_semantics<parallel>], iteration_bounds = array<i64: 1>, scalar_prefetch = 0 : i64, scratch_operands = 0 : i64, tpu.core_type = #tpu.core_type<tc>, window_params = [{transform_indices = @transform_0, window_bounds = array<i64: 16, 32>}, {pipeline_mode = #tpu.pipeline_mode<synchronous>, transform_indices = @transform_1, window_bounds = array<i64: 32, 96>}, {pipeline_mode = #tpu.pipeline_mode<synchronous>, transform_indices = @transform_2, window_bounds = array<i64: 32, 32>}, {pipeline_mode = #tpu.pipeline_mode<synchronous>, transform_indices = @transform_3, window_bounds = array<i64: 1, 32>}, {transform_indices = @transform_4, window_bounds = array<i64: 16, 32>}]} {
    %c0 = arith.constant 0 : index
    %c0_0 = arith.constant 0 : index
    %0 = vector.load %arg1[%c0, %c0_0] : memref<16x32xf32, #tpu.memory_space<vmem>>, vector<16x32xf32>
    %c0_1 = arith.constant 0 : index
    %c0_2 = arith.constant 0 : index
    %1 = vector.load %arg2[%c0_1, %c0_2] : memref<32x96xf32, #tpu.memory_space<vmem>>, vector<32x96xf32>
    %cst = arith.constant dense<0.000000e+00> : vector<16x96xf32>
    %2 = tpu.matmul %0, %1, %cst {dimension_numbers = #tpu.dot_dimension_numbers<[1], [0], [0], [1], [0, 0, 1, 1], [], []>} : vector<16x32xf32>, vector<32x96xf32>, vector<16x96xf32> -> vector<16x96xf32>
    %3 = vector.extract_strided_slice %2 {offsets = [0, 0], sizes = [16, 32], strides = [1, 1]} : vector<16x96xf32> to vector<16x32xf32>
    %4 = vector.shape_cast %3 : vector<16x32xf32> to vector<2x8x32xf32>
    %5 = vector.extract_strided_slice %2 {offsets = [0, 32], sizes = [16, 32], strides = [1, 1]} : vector<16x96xf32> to vector<16x32xf32>
    %6 = vector.shape_cast %5 : vector<16x32xf32> to vector<2x8x32xf32>
    %7 = vector.extract_strided_slice %2 {offsets = [0, 64], sizes = [16, 32], strides = [1, 1]} : vector<16x96xf32> to vector<16x32xf32>
    %8 = vector.shape_cast %7 : vector<16x32xf32> to vector<2x8x32xf32>
    %9 = vector.extract_strided_slice %4 {offsets = [0, 0, 0], sizes = [2, 8, 8], strides = [1, 1, 1]} : vector<2x8x32xf32> to vector<2x8x8xf32>
    %10 = vector.extract_strided_slice %4 {offsets = [0, 0, 8], sizes = [2, 8, 8], strides = [1, 1, 1]} : vector<2x8x32xf32> to vector<2x8x8xf32>
    %11 = vector.extract_strided_slice %4 {offsets = [0, 0, 16], sizes = [2, 8, 8], strides = [1, 1, 1]} : vector<2x8x32xf32> to vector<2x8x8xf32>
    %12 = vector.extract_strided_slice %4 {offsets = [0, 0, 24], sizes = [2, 8, 8], strides = [1, 1, 1]} : vector<2x8x32xf32> to vector<2x8x8xf32>
    %13 = tpu.concatenate %9, %10, %11, %12 in 0 : vector<2x8x8xf32>, vector<2x8x8xf32>, vector<2x8x8xf32>, vector<2x8x8xf32> -> vector<8x8x8xf32>
    %14 = vector.extract_strided_slice %6 {offsets = [0, 0, 0], sizes = [2, 8, 8], strides = [1, 1, 1]} : vector<2x8x32xf32> to vector<2x8x8xf32>
    %15 = vector.extract_strided_slice %6 {offsets = [0, 0, 8], sizes = [2, 8, 8], strides = [1, 1, 1]} : vector<2x8x32xf32> to vector<2x8x8xf32>
    %16 = vector.extract_strided_slice %6 {offsets = [0, 0, 16], sizes = [2, 8, 8], strides = [1, 1, 1]} : vector<2x8x32xf32> to vector<2x8x8xf32>
    %17 = vector.extract_strided_slice %6 {offsets = [0, 0, 24], sizes = [2, 8, 8], strides = [1, 1, 1]} : vector<2x8x32xf32> to vector<2x8x8xf32>
    %18 = tpu.concatenate %14, %15, %16, %17 in 0 : vector<2x8x8xf32>, vector<2x8x8xf32>, vector<2x8x8xf32>, vector<2x8x8xf32> -> vector<8x8x8xf32>
    %19 = vector.extract_strided_slice %8 {offsets = [0, 0, 0], sizes = [2, 8, 8], strides = [1, 1, 1]} : vector<2x8x32xf32> to vector<2x8x8xf32>
    %20 = vector.extract_strided_slice %8 {offsets = [0, 0, 8], sizes = [2, 8, 8], strides = [1, 1, 1]} : vector<2x8x32xf32> to vector<2x8x8xf32>
    %21 = vector.extract_strided_slice %8 {offsets = [0, 0, 16], sizes = [2, 8, 8], strides = [1, 1, 1]} : vector<2x8x32xf32> to vector<2x8x8xf32>
    %22 = vector.extract_strided_slice %8 {offsets = [0, 0, 24], sizes = [2, 8, 8], strides = [1, 1, 1]} : vector<2x8x32xf32> to vector<2x8x8xf32>
    %23 = tpu.concatenate %19, %20, %21, %22 in 0 : vector<2x8x8xf32>, vector<2x8x8xf32>, vector<2x8x8xf32>, vector<2x8x8xf32> -> vector<8x8x8xf32>
    %24 = tpu.iota {dimensions = array<i32: 0>} : vector<8x8xi32>
    %25 = tpu.iota {dimensions = array<i32: 1>} : vector<8x8xi32>
    %26 = arith.cmpi sle, %25, %24 : vector<8x8xi32>
    %27 = vector.shape_cast %26 : vector<8x8xi1> to vector<1x8x8xi1>
    "tpu.trace_start"() <{level = 10 : i32, message = "gtd,gsd->gts"}> : () -> ()
    %cst_3 = arith.constant dense<0.000000e+00> : vector<8x8x8xf32>
    %28 = tpu.matmul %13, %18, %cst_3 {dimension_numbers = #tpu.dot_dimension_numbers<[2], [2], [1], [1], [0, 0, 0, 1, 1, 1], [0], [0]>} : vector<8x8x8xf32>, vector<8x8x8xf32>, vector<8x8x8xf32> -> vector<8x8x8xf32>
    %cst_4 = arith.constant -1.000000e+30 : f32
    "tpu.trace_stop"() : () -> ()
    %29 = vector.shape_cast %27 : vector<1x8x8xi1> to vector<1x8x8xi1>
    %30 = vector.broadcast %29 : vector<1x8x8xi1> to vector<8x8x8xi1>
    %31 = vector.broadcast %cst_4 : f32 to vector<8x8x8xf32>
    %32 = arith.select %30, %28, %31 : vector<8x8x8xi1>, vector<8x8x8xf32>
    %cst_5 = arith.constant dense<0xFF800000> : vector<8x8xf32>
    %33 = vector.multi_reduction <maximumf>, %32, %cst_5 [2] : vector<8x8x8xf32> to vector<8x8xf32>
    %34 = vector.shape_cast %33 : vector<8x8xf32> to vector<8x8x1xf32>
    %35 = vector.broadcast %34 : vector<8x8x1xf32> to vector<8x8x8xf32>
    %36 = arith.subf %32, %35 : vector<8x8x8xf32>
    %37 = math.exp %36 : vector<8x8x8xf32>
    %cst_6 = arith.constant dense<0.000000e+00> : vector<8x8xf32>
    %38 = vector.multi_reduction <add>, %37, %cst_6 [2] : vector<8x8x8xf32> to vector<8x8xf32>
    %39 = vector.shape_cast %38 : vector<8x8xf32> to vector<8x8x1xf32>
    %40 = vector.broadcast %39 : vector<8x8x1xf32> to vector<8x8x8xf32>
    %41 = arith.divf %37, %40 : vector<8x8x8xf32>
    "tpu.trace_start"() <{level = 10 : i32, message = "gts,gsd->gtd"}> : () -> ()
    %cst_7 = arith.constant dense<0.000000e+00> : vector<8x8x8xf32>
    %42 = tpu.matmul %41, %23, %cst_7 {dimension_numbers = #tpu.dot_dimension_numbers<[2], [1], [1], [2], [0, 0, 0, 1, 1, 2], [0], [0]>} : vector<8x8x8xf32>, vector<8x8x8xf32>, vector<8x8x8xf32> -> vector<8x8x8xf32>
    %cst_8 = arith.constant 0.000000e+00 : f32
    "tpu.trace_stop"() : () -> ()
    %43 = vector.broadcast %cst_8 : f32 to vector<16x32xf32>
    %44 = vector.extract_strided_slice %42 {offsets = [0, 0, 0], sizes = [2, 8, 8], strides = [1, 1, 1]} : vector<8x8x8xf32> to vector<2x8x8xf32>
    %45 = vector.shape_cast %44 : vector<2x8x8xf32> to vector<16x8xf32>
    %c0_9 = arith.constant 0 : index
    %c0_10 = arith.constant 0 : index
    %46 = vector.load %arg3[%c0_9, %c0_10] : memref<32x32xf32, #tpu.memory_space<vmem>>, vector<8x32xf32>
    %cst_11 = arith.constant dense<0.000000e+00> : vector<16x32xf32>
    %47 = tpu.matmul %45, %46, %cst_11 {dimension_numbers = #tpu.dot_dimension_numbers<[1], [0], [0], [1], [0, 0, 1, 1], [], []>} : vector<16x8xf32>, vector<8x32xf32>, vector<16x32xf32> -> vector<16x32xf32>
    %48 = arith.addf %43, %47 : vector<16x32xf32>
    %49 = vector.extract_strided_slice %42 {offsets = [2, 0, 0], sizes = [2, 8, 8], strides = [1, 1, 1]} : vector<8x8x8xf32> to vector<2x8x8xf32>
    %50 = vector.shape_cast %49 : vector<2x8x8xf32> to vector<16x8xf32>
    %c8 = arith.constant 8 : index
    %c0_12 = arith.constant 0 : index
    %51 = vector.load %arg3[%c8, %c0_12] : memref<32x32xf32, #tpu.memory_space<vmem>>, vector<8x32xf32>
    %cst_13 = arith.constant dense<0.000000e+00> : vector<16x32xf32>
    %52 = tpu.matmul %50, %51, %cst_13 {dimension_numbers = #tpu.dot_dimension_numbers<[1], [0], [0], [1], [0, 0, 1, 1], [], []>} : vector<16x8xf32>, vector<8x32xf32>, vector<16x32xf32> -> vector<16x32xf32>
    %53 = arith.addf %48, %52 : vector<16x32xf32>
    %54 = vector.extract_strided_slice %42 {offsets = [4, 0, 0], sizes = [2, 8, 8], strides = [1, 1, 1]} : vector<8x8x8xf32> to vector<2x8x8xf32>
    %55 = vector.shape_cast %54 : vector<2x8x8xf32> to vector<16x8xf32>
    %c16 = arith.constant 16 : index
    %c0_14 = arith.constant 0 : index
    %56 = vector.load %arg3[%c16, %c0_14] : memref<32x32xf32, #tpu.memory_space<vmem>>, vector<8x32xf32>
    %cst_15 = arith.constant dense<0.000000e+00> : vector<16x32xf32>
    %57 = tpu.matmul %55, %56, %cst_15 {dimension_numbers = #tpu.dot_dimension_numbers<[1], [0], [0], [1], [0, 0, 1, 1], [], []>} : vector<16x8xf32>, vector<8x32xf32>, vector<16x32xf32> -> vector<16x32xf32>
    %58 = arith.addf %53, %57 : vector<16x32xf32>
    %59 = vector.extract_strided_slice %42 {offsets = [6, 0, 0], sizes = [2, 8, 8], strides = [1, 1, 1]} : vector<8x8x8xf32> to vector<2x8x8xf32>
    %60 = vector.shape_cast %59 : vector<2x8x8xf32> to vector<16x8xf32>
    %c24 = arith.constant 24 : index
    %c0_16 = arith.constant 0 : index
    %61 = vector.load %arg3[%c24, %c0_16] : memref<32x32xf32, #tpu.memory_space<vmem>>, vector<8x32xf32>
    %cst_17 = arith.constant dense<0.000000e+00> : vector<16x32xf32>
    %62 = tpu.matmul %60, %61, %cst_17 {dimension_numbers = #tpu.dot_dimension_numbers<[1], [0], [0], [1], [0, 0, 1, 1], [], []>} : vector<16x8xf32>, vector<8x32xf32>, vector<16x32xf32> -> vector<16x32xf32>
    %63 = arith.addf %58, %62 : vector<16x32xf32>
    %c0_18 = arith.constant 0 : index
    %c0_19 = arith.constant 0 : index
    %64 = vector.load %arg4[%c0_18, %c0_19] : memref<1x32xf32, #tpu.memory_space<vmem>>, vector<1x32xf32>
    %65 = vector.broadcast %64 : vector<1x32xf32> to vector<16x32xf32>
    %66 = arith.addf %63, %65 : vector<16x32xf32>
    %c0_20 = arith.constant 0 : index
    %c0_21 = arith.constant 0 : index
    %67 = vector.load %arg5[%c0_20, %c0_21] : memref<16x32xf32, #tpu.memory_space<vmem>>, vector<16x32xf32>
    tpu.vector_store %arg5[%c0_20, %c0_21], %66 {strides = array<i32>} : memref<16x32xf32, #tpu.memory_space<vmem>>, vector<16x32xf32>,
    return
  }
  func.func @transform_0(%arg0: i32) -> (i32, i32) {
    %c0_i32 = arith.constant 0 : i32
    %c0_i32_0 = arith.constant 0 : i32
    return %arg0, %c0_i32 : i32, i32
  }
  func.func @transform_1(%arg0: i32) -> (i32, i32) {
    %c0_i32 = arith.constant 0 : i32
    %c0_i32_0 = arith.constant 0 : i32
    %c0_i32_1 = arith.constant 0 : i32
    return %c0_i32, %c0_i32_0 : i32, i32
  }
  func.func @transform_2(%arg0: i32) -> (i32, i32) {
    %c0_i32 = arith.constant 0 : i32
    %c0_i32_0 = arith.constant 0 : i32
    %c0_i32_1 = arith.constant 0 : i32
    return %c0_i32, %c0_i32_0 : i32, i32
  }
  func.func @transform_3(%arg0: i32) -> (i32, i32) {
    %c0_i32 = arith.constant 0 : i32
    %c0_i32_0 = arith.constant 0 : i32
    %c0_i32_1 = arith.constant 0 : i32
    return %c0_i32, %c0_i32_0 : i32, i32
  }
  func.func @transform_4(%arg0: i32) -> (i32, i32) {
    %c0_i32 = arith.constant 0 : i32
    %c0_i32_0 = arith.constant 0 : i32
    return %arg0, %c0_i32 : i32, i32
  }
}

</mosaic_0001>

<bundles_post_ra>
// kernel: tpu_custom_call.1
= control target key start
LH: loop header
LB: loop body
LE: loop exit
PB: predicated region body
PF: predicated region fallthrough
CT: control target
= control target key end

     0   :  { %9 = vsyncpa [#allocation3], 0  ;;  %s2424_s0 = inlined_call_operand.hbm [shape: f32[16,32], index: 0, kind: input, shape index: {}]   ;;  %s2425_s1 = inlined_call_operand.hbm [shape: f32[32,96], index: 1, kind: input, shape index: {}]   ;;  %s2426_s2 = inlined_call_operand.hbm [shape: f32[32,32], index: 2, kind: input, shape index: {}]   ;;  %s2427_s3 = inlined_call_operand.vmem [shape: f32[1,32], index: 3, kind: input, shape index: {}]   ;;  %s2428_s4 = inlined_call_operand.hbm [shape: f32[16,32], index: 4, kind: output, shape index: {}]  }
   0x1   :  { %10 = vsyncpa [#allocation6], 0 }
   0x2   :  { %11 = vsyncpa [#allocation4], 0  ;;  %s2169_s15 = smov [#allocation5]   ;;  %s2170_s17 = smov [#allocation2]  }
   0x3   :  { %s29_s16 = sshll.u32 %s2169_s15, 4  ;;  %s17_s18 = sshll.u32 %s2170_s17, 4  ;;  %s30_s16 = int_to_ptr.vmem [resolvable:$true] %s29_s16  ;;  %s18_s18 = int_to_ptr.vmem [resolvable:$true] %s17_s18 }
   0x4   :  { %s2091_s19 = scalar_lea.vmem %s30_s16, 512  ;;  %p2096_p1 = scmp.lt.s32.totalorder %s30_s16, %s30_s16 }
   0x5   :  { %p2092_p0 = scmp.ne.s32.totalorder %s30_s16, %s2091_s19  ;;  %p2097_p2 = scmp.lt.s32.totalorder %s2091_s19, %s2091_s19 }
   0x7   :  { %p2098_p3 = por %p2097_p2, %p2096_p1 }
   0x9   :  { %p2099_p4 = pnand %p2098_p3, %p2092_p0 }
   0xb   :  { %2102 = shalt.err (!%p2099_p4)
}
   0xc   :  { %s2171_s20 = smov 128   ;;  %s2172_s21 = smov 8  }
   0xd   :  { %35 = dma.hbm_to_vmem [thread:$0]  %s2425_s1, 512, %s30_s16, [#allocation6], %s2171_s20, %s2171_s20, %s2172_s21  }
   0xe   :  { %s2111_s24 = scalar_lea.vmem %s18_s18, 256  ;;  %p2116_p6 = scmp.lt.s32.totalorder %s18_s18, %s18_s18 }
   0xf   :  { %p2112_p5 = scmp.ne.s32.totalorder %s18_s18, %s2111_s24  ;;  %p2117_p7 = scmp.lt.s32.totalorder %s2111_s24, %s2111_s24 }
  0x11   :  { %p2118_p8 = por %p2117_p7, %p2116_p6 }
  0x13   :  { %p2119_p9 = pnand %p2118_p8, %p2112_p5 }
  0x15   :  { %2122 = shalt.err (!%p2119_p9)
}
  0x16   :  { %23 = dma.hbm_to_vmem [thread:$0]  %s2424_s0, 256, %s18_s18, [#allocation3], %s2171_s20, %s2171_s20, %s2172_s21  }
  0x17   :  { %s2173_s27 = smov [#allocation7]  }
  0x18   :  { %s41_s28 = sshll.u32 %s2173_s27, 4  ;;  %s42_s28 = int_to_ptr.vmem [resolvable:$true] %s41_s28 }
  0x19   :  { %s2131_s29 = scalar_lea.vmem %s42_s28, 512  ;;  %p2136_p11 = scmp.lt.s32.totalorder %s42_s28, %s42_s28 }
  0x1a   :  { %p2132_p10 = scmp.ne.s32.totalorder %s42_s28, %s2131_s29  ;;  %p2137_p12 = scmp.lt.s32.totalorder %s2131_s29, %s2131_s29 }
  0x1c   :  { %p2138_p13 = por %p2137_p12, %p2136_p11 }
  0x1e   :  { %p2139_p0 = pnand %p2138_p13, %p2132_p10 }
  0x20   :  { %2142 = shalt.err (!%p2139_p0)
}
  0x21   :  { %47 = dma.hbm_to_vmem [thread:$0]  %s2426_s2, 512, %s42_s28, [#allocation6], %s2171_s20, %s2171_s20, %s2172_s21  }
  0x22   :  { %2163 = dma.done.wait [#allocation3], 256  }
  0x23   :  { %2164 = vsyncadd [#allocation3], 4294967040 }
  0x24   :  { %2165 = dma.done.wait [#allocation6], 1024  }
  0x25   :  { %2166 = vsyncadd [#allocation6], 4294966272  ;;  %vm65_vm0 = vcmask 261120   ;;  %v64_v0 = vld [vmem:[#allocation5 + $0x18] sm:$0xff]  ;;  %v63_v1 = vld [vmem:[#allocation5 + $0x10] sm:$0xff]  ;;  %v2174_v6 = vmov 0.0   ;;  %v161_v23 = vlaneseq }
  0x26   :  { %1927 = vmatprep.subr.mxu0 %v64_v0  ;;  %v59_v2 = vld [vmem:[#allocation2] sm:$0xff]  ;;  %v62_v3 = vld [vmem:[#allocation5 + $0x8] sm:$0xff]  ;;  %v61_v4 = vld [vmem:[#allocation5] sm:$0xff]  ;;  %1938 = vmatprep.subr.mxu1 %v2174_v6  ;;  %s2175_s0 = smov 112   ;;  %s2176_s2 = smov 120   ;;  %vm2177_vm1 = vmmov 0  }
  0x27   :  { %1928 = vmatpush3.msra.mxu0 %v64_v0  ;;  %1935 = vmatprep.mubr.msk.f32.mxu0 %vm65_vm0, %v59_v2  ;;  %v60_v5 = vld [vmem:[#allocation2 + $0x8] sm:$0xff]  ;;  %s2178_s5 = smov 104   ;;  %s2179_s6 = smov 96   ;;  %vm168_vm2 = vcmask 64512   ;;  %v162_v24 = vshrl.u32 %v161_v23, 7  ;;  %v164_v25 = vand.u32 127, %v161_v23 }
  0x28   :  { %1929 = vmatprep.subr.mxu0 %v63_v1  ;;  %1940 = vmatprep.mubr.msk.f32.mxu1 %vm2177_vm1, %v2174_v6  ;;  %s2180_s7 = smov 64   ;;  %s2181_s10 = smov [#allocation8]  }
  0x29   :  { %1930 = vmatpush3.msra.mxu0 %v63_v1  ;;  %vm2311_vm3 = vcmp.le.s32.totalorder %v164_v25, %v162_v24  ;;  %s1829_s11 = sshll.u32 %s2181_s10, 4  ;;  %s1830_s11 = int_to_ptr.vmem [resolvable:$true] %s1829_s11 }
  0x2a   :  { %1931 = vmatprep.subr.mxu0 %v62_v3  ;;  %s2143_s12 = scalar_lea.vmem %s1830_s11, 256  ;;  %p2148_p2 = scmp.lt.s32.totalorder %s1830_s11, %s1830_s11 }
  0x2b   :  { %1932 = vmatpush3.msra.mxu0 %v62_v3  ;;  %p2144_p1 = scmp.ne.s32.totalorder %s1830_s11, %s2143_s12  ;;  %p2149_p3 = scmp.lt.s32.totalorder %s2143_s12, %s2143_s12 }
  0x2c   :  { %1933 = vmatprep.subr.mxu0 %v61_v4 }
  0x2d   :  { %1934 = vmatpush3.msra.mxu0 %v61_v4  ;;  %p2150_p4 = por %p2149_p3, %p2148_p2 }
  0x2e   :  { %1936 = vmatmul.mubr.msk.f32.vlgmr.msra.gmra.mxu0 %vm65_vm0, %v60_v5  ;;  %1948 = vmatprep.subr.mxu0 %v2174_v6 }
  0x2f   :  { %1950 = vmatprep.mubr.msk.f32.mxu0 %vm2177_vm1, %v2174_v6  ;;  %p2151_p5 = pnand %p2150_p4, %p2144_p1 }
  0xee   :  { %v2229_v7 = vpop.f32.mrf.mxu0 }
  0xf0   :  { %v2231_v8 = vpop.f32.mrf.mxu0 }
  0xf1   :  { %153 = vrot.lane.b32.xlu1 %v2231_v8, %s2175_s0  ;;  %149 = vrot.lane.b32.xlu0 %v2231_v8, %s2176_s2 }
  0xf5   :  { %155 = vrot.lane.b32.xlu1 %v2229_v7, %s2175_s0  ;;  %151 = vrot.lane.b32.xlu0 %v2229_v7, %s2176_s2 }
  0xf9   :  { %159 = vrot.lane.b32.xlu1 %v2229_v7, %s2178_s5  ;;  %157 = vrot.lane.b32.xlu0 %v2231_v8, %s2178_s5 }
  0xfd   :  { %243 = vrot.lane.b32.xlu1 %v2229_v7, %s2179_s6  ;;  %166 = vrot.lane.b32.xlu0 %v2231_v8, %s2179_s6 }
 0x163   :  { %v2245_v9 = vpop.permute.xlu1 %153  ;;  %v2247_v10 = vpop.permute.xlu0 %149 }
 0x164   :  { %319 = vrot.lane.b32.xlu0 %v2247_v10, %s2179_s6 }
 0x167   :  { %v2250_v11 = vpop.permute.xlu1 %155  ;;  %v2252_v12 = vpop.permute.xlu0 %151 }
 0x168   :  { %471 = vrot.lane.b32.xlu0 %v2245_v9, %s2179_s6  ;;  %395 = vrot.lane.b32.xlu1 %v2252_v12, %s2179_s6 }
 0x16b   :  { %v2256_v13 = vpop.permute.xlu0 %157  ;;  %v2260_v14 = vpop.permute.xlu1 %159 }
 0x16c   :  { %547 = vrot.lane.b32.xlu1 %v2250_v11, %s2179_s6  ;;  %623 = vrot.lane.b32.xlu0 %v2256_v13, %s2179_s6 }
 0x16f   :  { %v167_v15 = vpop.permute.xlu0 %166  ;;  %v244_v16 = vpop.permute.xlu1 %243 }
 0x170   :  { %699 = vrot.lane.b32.xlu1 %v2260_v14, %s2179_s6  ;;  %1939 = vmatpush3.xpose.msk.msra.mxu1 %vm168_vm2, %v167_v15 }
 0x171   :  { %1943 = vmatprep.subr.mxu1 %v2174_v6 }
 0x173   :  { %1941 = vmatmul.mubr.msk.f32.vlgmr.msra.gmra.mxu1 %vm168_vm2, %v2231_v8 }
 0x174   :  { %1944 = vmatpush3.xpose.msk.msra.mxu1 %vm168_vm2, %v244_v16  ;;  %1945 = vmatprep.mubr.msk.f32.mxu1 %vm2177_vm1, %v2174_v6 }
 0x175   :  { %1953 = vmatprep.subr.mxu1 %v2174_v6 }
 0x177   :  { %1946 = vmatmul.mubr.msk.f32.vlgmr.msra.gmra.mxu1 %vm168_vm2, %v2229_v7 }
 0x178   :  { %1955 = vmatprep.mubr.msk.f32.mxu1 %vm2177_vm1, %v2174_v6 }
 0x1d6   :  { %v320_v17 = vpop.permute.xlu0 %319 }
 0x1d7   :  { %1949 = vmatpush3.xpose.msk.msra.mxu0 %vm168_vm2, %v320_v17 }
 0x1d8   :  { %1958 = vmatprep.subr.mxu0 %v2174_v6 }
 0x1da   :  { %v396_v18 = vpop.permute.xlu1 %395  ;;  %1951 = vmatmul.mubr.msk.f32.vlgmr.msra.gmra.mxu0 %vm168_vm2, %v2247_v10  ;;  %v472_v19 = vpop.permute.xlu0 %471 }
 0x1db   :  { %1954 = vmatpush3.xpose.msk.msra.mxu1 %vm168_vm2, %v396_v18  ;;  %1959 = vmatpush3.xpose.msk.msra.mxu0 %vm168_vm2, %v472_v19 }
 0x1dc   :  { %1960 = vmatprep.mubr.msk.f32.mxu0 %vm2177_vm1, %v2174_v6  ;;  %1963 = vmatprep.subr.mxu1 %v2174_v6 }
 0x1dd   :  { %1968 = vmatprep.subr.mxu0 %v2174_v6 }
 0x1de   :  { %v548_v20 = vpop.permute.xlu1 %547  ;;  %1956 = vmatmul.mubr.msk.f32.vlgmr.msra.gmra.mxu1 %vm168_vm2, %v2252_v12  ;;  %1961 = vmatmul.mubr.msk.f32.vlgmr.msra.gmra.mxu0 %vm168_vm2, %v2245_v9  ;;  %v624_v21 = vpop.permute.xlu0 %623 }
 0x1df   :  { %1964 = vmatpush3.xpose.msk.msra.mxu1 %vm168_vm2, %v548_v20  ;;  %1969 = vmatpush3.xpose.msk.msra.mxu0 %vm168_vm2, %v624_v21 }
 0x1e0   :  { %1965 = vmatprep.mubr.msk.f32.mxu1 %vm2177_vm1, %v2174_v6  ;;  %1970 = vmatprep.mubr.msk.f32.mxu0 %vm2177_vm1, %v2174_v6 }
 0x1e1   :  { %1973 = vmatprep.subr.mxu1 %v2174_v6  ;;  %1978 = vmatprep.subr.mxu0 %v2174_v6 }
 0x1e2   :  { %v700_v22 = vpop.permute.xlu1 %699  ;;  %1966 = vmatmul.mubr.msk.f32.vlgmr.msra.gmra.mxu1 %vm168_vm2, %v2250_v11  ;;  %1971 = vmatmul.mubr.msk.f32.vlgmr.msra.gmra.mxu0 %vm168_vm2, %v2256_v13 }
 0x1e3   :  { %1974 = vmatpush3.xpose.msk.msra.mxu1 %vm168_vm2, %v700_v22  ;;  %1975 = vmatprep.mubr.msk.f32.mxu1 %vm2177_vm1, %v2174_v6 }
 0x1e4   :  { %1983 = vmatprep.subr.mxu1 %v2174_v6  ;;  %1980 = vmatprep.mubr.msk.f32.mxu0 %vm2177_vm1, %v2174_v6 }
 0x1e6   :  { %1976 = vmatmul.mubr.msk.f32.vlgmr.msra.gmra.mxu1 %vm168_vm2, %v2260_v14 }
 0x1e7   :  { %1985 = vmatprep.mubr.msk.f32.mxu1 %vm2177_vm1, %v2174_v6 }
 0x233   :  { %v239_v27 = vpop.f32.mrf.mxu1 }
 0x234   :  { %v777_v28 = vsel %vm2311_vm3, %v239_v27, -1e+30 }
 0x235   :  { %v1942_v29 = vpop.f32.mrf.mxu1  ;;  %v785_v30 = vsel %vm168_vm2, %v777_v28, -inf }
 0x236   :  { %786 = vmax.xlane.f32.xlu0 %v785_v30 }
 0x237   :  { %v315_v31 = vpop.f32.mrf.mxu1 }
 0x238   :  { %v778_v32 = vsel %vm2311_vm3, %v315_v31, -1e+30 }
 0x239   :  { %v1947_v33 = vpop.f32.mrf.mxu1  ;;  %v788_v34 = vsel %vm168_vm2, %v778_v32, -inf }
 0x23a   :  { %789 = vmax.xlane.f32.xlu1 %v788_v34 }
 0x29a   :  { %v391_v35 = vpop.f32.mrf.mxu0 }
 0x29b   :  { %v779_v36 = vsel %vm2311_vm3, %v391_v35, -1e+30 }
 0x29c   :  { %v1952_v37 = vpop.f32.mrf.mxu0  ;;  %v791_v38 = vsel %vm168_vm2, %v779_v36, -inf }
 0x29d   :  { %792 = vmax.xlane.f32.xlu0 %v791_v38 }
 0x29e   :  { %v467_v39 = vpop.f32.mrf.mxu1  ;;  %v543_v40 = vpop.f32.mrf.mxu0 }
 0x29f   :  { %v780_v41 = vsel %vm2311_vm3, %v467_v39, -1e+30  ;;  %v781_v42 = vsel %vm2311_vm3, %v543_v40, -1e+30 }
 0x2a0   :  { %v1957_v43 = vpop.f32.mrf.mxu1  ;;  %v1962_v44 = vpop.f32.mrf.mxu0  ;;  %v794_v45 = vsel %vm168_vm2, %v780_v41, -inf  ;;  %v797_v46 = vsel %vm168_vm2, %v781_v42, -inf }
 0x2a1   :  { %795 = vmax.xlane.f32.xlu0 %v794_v45  ;;  %798 = vmax.xlane.f32.xlu1 %v797_v46 }
 0x2a2   :  { %v619_v47 = vpop.f32.mrf.mxu1  ;;  %v695_v48 = vpop.f32.mrf.mxu0 }
 0x2a3   :  { %v782_v49 = vsel %vm2311_vm3, %v619_v47, -1e+30  ;;  %v783_v50 = vsel %vm2311_vm3, %v695_v48, -1e+30 }
 0x2a4   :  { %v1967_v51 = vpop.f32.mrf.mxu1  ;;  %v1972_v52 = vpop.f32.mrf.mxu0  ;;  %v800_v53 = vsel %vm168_vm2, %v782_v49, -inf  ;;  %v803_v54 = vsel %vm168_vm2, %v783_v50, -inf }
 0x2a5   :  { %801 = vmax.xlane.f32.xlu0 %v800_v53  ;;  %804 = vmax.xlane.f32.xlu1 %v803_v54 }
 0x2a6   :  { %v771_v55 = vpop.f32.mrf.mxu1 }
 0x2a7   :  { %v784_v56 = vsel %vm2311_vm3, %v771_v55, -1e+30 }
 0x2a8   :  { %v1977_v57 = vpop.f32.mrf.mxu1  ;;  %v806_v58 = vsel %vm168_vm2, %v784_v56, -inf }
 0x2a9   :  { %807 = vmax.xlane.f32.xlu0 %v806_v58 }
 0x2b6   :  { %873 = vrot.lane.b32.xlu1 %v2231_v8, %s2180_s7 }
 0x2ba   :  { %1025 = vrot.lane.b32.xlu1 %v2247_v10, %s2180_s7 }
 0x2be   :  { %1101 = vrot.lane.b32.xlu1 %v2252_v12, %s2180_s7 }
 0x2bf   :  { %949 = vrot.lane.b32.xlu0 %v2229_v7, %s2180_s7  ;;  %v787_v61 = vpop.xlane.xlu0 %786 }
 0x2c0   :  { %v809_v62 = vsub.f32 %v777_v28, %v787_v61 }
 0x2c2   :  { %1253 = vrot.lane.b32.xlu1 %v2250_v11, %s2180_s7  ;;  %v817_v0 = vmul.f32 1.442695, %v809_v62 }
 0x2c3   :  { %1177 = vrot.lane.b32.xlu0 %v2245_v9, %s2180_s7  ;;  %v790_v59 = vpop.xlane.xlu1 %789 }
 0x2c4   :  { %v810_v60 = vsub.f32 %v778_v32, %v790_v59 }
 0x2c6   :  { %v819_v63 = vmul.f32 1.442695, %v810_v60 }
 0x2c8   :  { %2051 = vpow2.f32 %v819_v63 }
 0x2c9   :  { %2053 = vpow2.f32 %v817_v0 }
 0x2d5   :  { %v2351_v1 = vpop.eup %2051 }
 0x2d6   :  { %v836_v2 = vsel %vm168_vm2, %v2351_v1, 0.0  ;;  %v2355_v3 = vpop.eup %2053 }
 0x2d7   :  { %v833_v4 = vsel %vm168_vm2, %v2355_v3, 0.0 }
 0x2e2   :  { %837 = vadd.xlane.f32.xlu0 %v836_v2 }
 0x2e6   :  { %834 = vadd.xlane.f32.xlu1 %v833_v4 }
 0x326   :  { %v793_v5 = vpop.xlane.xlu0 %792 }
 0x327   :  { %v811_v7 = vsub.f32 %v779_v36, %v793_v5  ;;  %v1482_v5 = vld [vmem:[#allocation7 + $0x8] sm:$0xff] }
 0x329   :  { %v821_v8 = vmul.f32 1.442695, %v811_v7  ;;  %v1645_v7 = vld [vmem:[#allocation7 + $0x10] sm:$0xff] }
 0x32a   :  { %v799_v9 = vpop.xlane.xlu1 %798  ;;  %v796_v10 = vpop.xlane.xlu0 %795 }
 0x32b   :  { %2055 = vpow2.f32 %v821_v8  ;;  %v813_v11 = vsub.f32 %v781_v42, %v799_v9  ;;  %v812_v12 = vsub.f32 %v780_v41, %v796_v10  ;;  %v1729_v8 = vld [vmem:[#allocation7 + $0x18] sm:$0xff] }
 0x32d   :  { %v825_v15 = vmul.f32 1.442695, %v813_v11  ;;  %v823_v16 = vmul.f32 1.442695, %v812_v12 }
 0x32e   :  { %v805_v17 = vpop.xlane.xlu1 %804  ;;  %v802_v18 = vpop.xlane.xlu0 %801 }
 0x32f   :  { %2057 = vpow2.f32 %v825_v15  ;;  %v815_v19 = vsub.f32 %v783_v50, %v805_v17  ;;  %v814_v20 = vsub.f32 %v782_v49, %v802_v18 }
 0x330   :  { %2059 = vpow2.f32 %v823_v16 }
 0x331   :  { %v829_v21 = vmul.f32 1.442695, %v815_v19  ;;  %v827_v22 = vmul.f32 1.442695, %v814_v20 }
 0x332   :  { %v874_v23 = vpop.permute.xlu1 %873  ;;  %v808_v24 = vpop.xlane.xlu0 %807 }
 0x333   :  { %2061 = vpow2.f32 %v829_v21  ;;  %v816_v25 = vsub.f32 %v784_v56, %v808_v24  ;;  %1979 = vmatpush3.msra.mxu0 %v874_v23 }
 0x334   :  { %2063 = vpow2.f32 %v827_v22  ;;  %1988 = vmatprep.subr.mxu0 %v2174_v6 }
 0x335   :  { %v831_v26 = vmul.f32 1.442695, %v816_v25 }
 0x336   :  { %v950_v27 = vpop.permute.xlu0 %949  ;;  %v1026_v40 = vpop.permute.xlu1 %1025 }
 0x337   :  { %2065 = vpow2.f32 %v831_v26  ;;  %1984 = vmatpush3.msra.mxu1 %v950_v27 }
 0x338   :  { %v2056_v28 = vpop.eup %2055  ;;  %1993 = vmatprep.subr.mxu1 %v2174_v6 }
 0x339   :  { %v839_v29 = vsel %vm168_vm2, %v2056_v28, 0.0 }
 0x33a   :  { %840 = vadd.xlane.f32.xlu1 %v839_v29  ;;  %v1102_v41 = vpop.permute.xlu1 %1101  ;;  %v1178_v42 = vpop.permute.xlu0 %1177 }
 0x33c   :  { %v2058_v30 = vpop.eup %2057 }
 0x33d   :  { %v2060_v31 = vpop.eup %2059  ;;  %v845_v32 = vsel %vm168_vm2, %v2058_v30, 0.0 }
 0x33e   :  { %846 = vadd.xlane.f32.xlu1 %v845_v32  ;;  %v842_v33 = vsel %vm168_vm2, %v2060_v31, 0.0  ;;  %v1254_v43 = vpop.permute.xlu1 %1253 }
 0x33f   :  { %843 = vadd.xlane.f32.xlu0 %v842_v33 }
 0x340   :  { %v2062_v34 = vpop.eup %2061 }
 0x341   :  { %v2364_v35 = vpop.eup %2063  ;;  %v851_v36 = vsel %vm168_vm2, %v2062_v34, 0.0 }
 0x342   :  { %852 = vadd.xlane.f32.xlu1 %v851_v36  ;;  %v848_v37 = vsel %vm168_vm2, %v2364_v35, 0.0  ;;  %v1876_v36 = vld [vmem:[%s2427_s3] ss:$0 sm:$0xff] }
 0x343   :  { %849 = vadd.xlane.f32.xlu0 %v848_v37 }
 0x344   :  { %v2369_v38 = vpop.eup %2065 }
 0x345   :  { %v854_v39 = vsel %vm168_vm2, %v2369_v38, 0.0 }
 0x347   :  { %855 = vadd.xlane.f32.xlu0 %v854_v39 }
 0x353   :  { %1405 = vrot.lane.b32.xlu1 %v2260_v14, %s2180_s7 }
 0x35d   :  { %1329 = vrot.lane.b32.xlu0 %v2256_v13, %s2180_s7 }
 0x36b   :  { %v838_v44 = vpop.xlane.xlu0 %837 }
 0x36c   :  { %2067 = vrcp.f32 %v838_v44 }
 0x36f   :  { %v835_v45 = vpop.xlane.xlu1 %834 }
 0x370   :  { %2069 = vrcp.f32 %v835_v45 }
 0x379   :  { %v2068_v46 = vpop.eup %2067 }
 0x37a   :  { %v860_v47 = vmul.f32 %v2068_v46, %v2351_v1  ;;  %v1481_v1 = vld [vmem:[#allocation7] sm:$0xff] }
 0x37c   :  { %1986 = vmatmul.mubr.msk.f32.vlgmr.msra.gmra.mxu1 %vm168_vm2, %v860_v47 }
 0x37d   :  { %v2070_v48 = vpop.eup %2069  ;;  %1994 = vmatpush3.msra.mxu1 %v1102_v41  ;;  %1995 = vmatprep.mubr.msk.f32.mxu1 %vm2177_vm1, %v2174_v6 }
 0x37e   :  { %v858_v13 = vmul.f32 %v2070_v48, %v2355_v3  ;;  %2003 = vmatprep.subr.mxu1 %v2174_v6 }
 0x380   :  { %1981 = vmatmul.mubr.msk.f32.vlgmr.msra.gmra.mxu0 %vm168_vm2, %v858_v13 }
 0x381   :  { %1989 = vmatpush3.msra.mxu0 %v1026_v40  ;;  %1990 = vmatprep.mubr.msk.f32.mxu0 %vm2177_vm1, %v2174_v6 }
 0x382   :  { %1998 = vmatprep.subr.mxu0 %v2174_v6 }
 0x3c3   :  { %v841_v14 = vpop.xlane.xlu1 %840 }
 0x3c4   :  { %2071 = vrcp.f32 %v841_v14 }
 0x3c7   :  { %v847_v49 = vpop.xlane.xlu1 %846 }
 0x3c8   :  { %2073 = vrcp.f32 %v847_v49  ;;  %v844_v50 = vpop.xlane.xlu0 %843 }
 0x3c9   :  { %2075 = vrcp.f32 %v844_v50 }
 0x3cb   :  { %v853_v51 = vpop.xlane.xlu1 %852 }
 0x3cc   :  { %2077 = vrcp.f32 %v853_v51  ;;  %v850_v52 = vpop.xlane.xlu0 %849 }
 0x3cd   :  { %2079 = vrcp.f32 %v850_v52 }
 0x3cf   :  { %v1406_v2 = vpop.permute.xlu1 %1405 }
 0x3d0   :  { %v856_v53 = vpop.xlane.xlu0 %855 }
 0x3d1   :  { %v2072_v54 = vpop.eup %2071  ;;  %2081 = vrcp.f32 %v856_v53 }
 0x3d2   :  { %v862_v55 = vmul.f32 %v2072_v54, %v2056_v28 }
 0x3d4   :  { %1991 = vmatmul.mubr.msk.f32.vlgmr.msra.gmra.mxu0 %vm168_vm2, %v862_v55  ;;  %v1330_v60 = vpop.permute.xlu0 %1329 }
 0x3d5   :  { %v2074_v56 = vpop.eup %2073  ;;  %1999 = vmatpush3.msra.mxu0 %v1178_v42  ;;  %2000 = vmatprep.mubr.msk.f32.mxu0 %vm2177_vm1, %v2174_v6 }
 0x3d6   :  { %v2076_v57 = vpop.eup %2075  ;;  %2008 = vmatprep.subr.mxu0 %v2174_v6  ;;  %v866_v58 = vmul.f32 %v2074_v56, %v2058_v30 }
 0x3d7   :  { %v864_v59 = vmul.f32 %v2076_v57, %v2060_v31 }
 0x3d8   :  { %2001 = vmatmul.mubr.msk.f32.vlgmr.msra.gmra.mxu0 %vm168_vm2, %v866_v58 }
 0x3d9   :  { %v2078_v61 = vpop.eup %2077  ;;  %1996 = vmatmul.mubr.msk.f32.vlgmr.msra.gmra.mxu1 %vm168_vm2, %v864_v59  ;;  %2009 = vmatpush3.msra.mxu0 %v1330_v60 }
 0x3da   :  { %v2080_v62 = vpop.eup %2079  ;;  %2004 = vmatpush3.msra.mxu1 %v1254_v43  ;;  %2005 = vmatprep.mubr.msk.f32.mxu1 %vm2177_vm1, %v2174_v6  ;;  %v870_v63 = vmul.f32 %v2078_v61, %v2062_v34 }
 0x3db   :  { %2010 = vmatprep.mubr.msk.f32.mxu0 %vm2177_vm1, %v2174_v6  ;;  %2013 = vmatprep.subr.mxu1 %v2174_v6  ;;  %v868_v0 = vmul.f32 %v2080_v62, %v2364_v35 }
 0x3dc   :  { %2011 = vmatmul.mubr.msk.f32.vlgmr.msra.gmra.mxu0 %vm168_vm2, %v870_v63  ;;  %2018 = vmatprep.subr.mxu0 %v1482_v5 }
 0x3dd   :  { %2006 = vmatmul.mubr.msk.f32.vlgmr.msra.gmra.mxu1 %vm168_vm2, %v868_v0  ;;  %2019 = vmatpush3.msra.mxu0 %v1482_v5 }
 0x3de   :  { %v2082_v3 = vpop.eup %2081  ;;  %2014 = vmatpush3.msra.mxu1 %v1406_v2  ;;  %2015 = vmatprep.mubr.msk.f32.mxu1 %vm2177_vm1, %v2174_v6 }
 0x3df   :  { %v872_v4 = vmul.f32 %v2082_v3, %v2369_v38  ;;  %2023 = vmatprep.subr.mxu1 %v1481_v1  ;;  %2028 = vmatprep.subr.mxu0 %v1645_v7 }
 0x3e1   :  { %2016 = vmatmul.mubr.msk.f32.vlgmr.msra.gmra.mxu1 %vm168_vm2, %v872_v4 }
 0x3e2   :  { %2024 = vmatpush3.msra.mxu1 %v1481_v1 }
 0x3e3   :  { %2033 = vmatprep.subr.mxu1 %v1729_v8 }
 0x43c   :  { %v1021_v9 = vpop.f32.mrf.mxu1 }
 0x43e   :  { %v1987_v10 = vpop.f32.mrf.mxu1 }
 0x440   :  { %v945_v11 = vpop.f32.mrf.mxu0 }
 0x441   :  { %2025 = vmatprep.mubr.msk.f32.mxu1 %vm168_vm2, %v945_v11 }
 0x442   :  { %v1982_v12 = vpop.f32.mrf.mxu0  ;;  %2026 = vmatmul.mubr.msk.f32.vlgmr.msra.gmra.mxu1 %vm168_vm2, %v1021_v9 }
 0x443   :  { %2034 = vmatpush3.msra.mxu1 %v1729_v8 }
 0x494   :  { %v1097_v6 = vpop.f32.mrf.mxu0 }
 0x495   :  { %2020 = vmatprep.mubr.msk.f32.mxu0 %vm168_vm2, %v1097_v6 }
 0x496   :  { %v1992_v15 = vpop.f32.mrf.mxu0 }
 0x498   :  { %v1249_v16 = vpop.f32.mrf.mxu0 }
 0x499   :  { %v1173_v17 = vpop.f32.mrf.mxu1 }
 0x49a   :  { %2021 = vmatmul.mubr.msk.f32.vlgmr.msra.gmra.mxu0 %vm168_vm2, %v1173_v17  ;;  %v2002_v18 = vpop.f32.mrf.mxu0 }
 0x49b   :  { %v1997_v19 = vpop.f32.mrf.mxu1  ;;  %2030 = vmatprep.mubr.msk.f32.mxu0 %vm168_vm2, %v1249_v16  ;;  %2029 = vmatpush3.msra.mxu0 %v1645_v7 }
 0x49c   :  { %v1401_v20 = vpop.f32.mrf.mxu0 }
 0x49d   :  { %v1325_v21 = vpop.f32.mrf.mxu1  ;;  %2035 = vmatprep.mubr.msk.f32.mxu1 %vm168_vm2, %v1401_v20 }
 0x49e   :  { %2031 = vmatmul.mubr.msk.f32.vlgmr.msra.gmra.mxu0 %vm168_vm2, %v1325_v21  ;;  %v2012_v22 = vpop.f32.mrf.mxu0 }
 0x49f   :  { %v2007_v23 = vpop.f32.mrf.mxu1 }
 0x4a1   :  { %v1477_v24 = vpop.f32.mrf.mxu1 }
 0x4a2   :  { %2036 = vmatmul.mubr.msk.f32.vlgmr.msra.gmra.mxu1 %vm168_vm2, %v1477_v24 }
 0x4a3   :  { %v2017_v25 = vpop.f32.mrf.mxu1 }
 0x502   :  { %v2027_v27 = vpop.f32.mrf.mxu1 }
 0x504   :  { %v1636_v31 = vpop.f32.mrf.mxu1 }
 0x55a   :  { %v2022_v26 = vpop.f32.mrf.mxu0 }
 0x55b   :  { %v1642_v30 = vadd.f32 %v2027_v27, %v2022_v26 }
 0x55c   :  { %v1555_v28 = vpop.f32.mrf.mxu0 }
 0x55d   :  { %v1637_v33 = vadd.f32 %v1636_v31, %v1555_v28 }
 0x55e   :  { %v2032_v29 = vpop.f32.mrf.mxu0 }
 0x55f   :  { %v1728_v34 = vadd.f32 %v2032_v29, %v1642_v30 }
 0x560   :  { %v1718_v32 = vpop.f32.mrf.mxu0 }
 0x561   :  { %v1727_v37 = vadd.f32 %v1718_v32, %v1637_v33 }
 0x562   :  { %v2037_v35 = vpop.f32.mrf.mxu1 }
 0x563   :  { %v1812_v38 = vadd.f32 %v2037_v35, %v1728_v34 }
 0x564   :  { %v1802_v39 = vpop.f32.mrf.mxu1 }
 0x565   :  { %v1821_v40 = vadd.f32 %v1876_v36, %v1812_v38  ;;  %v1811_v41 = vadd.f32 %v1802_v39, %v1727_v37 }
 0x567   :  { %1823 = vst.msk [vmem:[#allocation8 + $0x8] sm:$0xff] %vm65_vm0, %v1821_v40  ;;  %v1820_v42 = vadd.f32 %v1876_v36, %v1811_v41 }
 0x569   :  { %1822 = vst.msk [vmem:[#allocation8] sm:$0xff] %vm65_vm0, %v1820_v42 }
 0x56a   :  { %2154 = shalt.err (!%p2151_p5)
}
 0x56b   :  { %1835 = dma.vmem_to_hbm [thread:$0]  %s1830_s11, 256, %s2428_s4, [#allocation4], %s2171_s20, %s2171_s20, %s2172_s21  }
 0x56c   :  { %2167 = dma.done.wait [#allocation4], 256  }
 0x56d   :  { %2168 = vsyncadd [#allocation4], 4294967040 }
 0x56e   :  { %1839 = vsyncpa [#allocation3], 1 }
 0x56f   :  { %1840 = vsyncpa [#allocation6], 1 }
 0x570   :  { %1841 = vsyncpa [#allocation4], 1 }

</bundles_post_ra>
